<compile_context>
chip_gen: v7x
topology: tpu7x:2x2x1
jax: 0.10.0
libtpu: 0.0.40
codegen_flags: <defaults>
</compile_context>

<pallas_src>
import jax
import jax.numpy as jnp
from jax.experimental import pallas as pl
from jax.experimental.pallas import tpu as pltpu

_LANE = 128  # TPU vreg lane width


def _round_up(x: int, m: int) -> int:
    return ((x + m - 1) // m) * m


def _attention_map_kernel(w_ref, x_ref, o_ref):
    # w_ref: (C,) f32 weight in SMEM (whole array, constant across the grid)
    # x_ref: (TN, C, THW) input block in VMEM
    # o_ref: (TN, THW) output block in VMEM (sublane/lane dense)
    C = x_ref.shape[1]
    # 1x1 conv with out_channels=1, no bias == weighted sum over channels.
    # Per-channel accumulate with scalar-broadcast weights: one (TN, THW) f32 accumulator
    # plus one channel slice live at a time -- compute stays free filler under the DMA
    # roofline and never blows the VMEM budget.
    acc = x_ref[:, 0, :].astype(jnp.float32) * w_ref[0]
    for c in range(1, C):  # static unroll; channel slices are zero-cost static views
        acc = acc + x_ref[:, c, :].astype(jnp.float32) * w_ref[c]
    o_ref[...] = jnp.maximum(acc, 0.0).astype(o_ref.dtype)


def attention_map_forward(x_nchw: jax.Array, weight: jax.Array) -> jax.Array:
    """x_nchw: (N, C, H, W); weight: (1, C, 1, 1) conv weight. Returns (N, 1, H, W)."""
    N, C, H, W = x_nchw.shape
    HW = H * W
    dtype = x_nchw.dtype
    itemsize = jnp.dtype(dtype).itemsize
    sub = {4: 8, 2: 16, 1: 32}.get(itemsize, 8)   # sublane packing for this dtype
    C_pad = _round_up(C, sub)                     # real VMEM footprint of the channel axis

    # ---- generation-aware sizing -------------------------------------------------------
    try:
        vmem_cap = int(pltpu.get_tpu_info().vmem_capacity_bytes)
    except Exception:
        vmem_cap = 64 << 20                       # conservative (v7x-sized) fallback
    target_in_bytes = (8 << 20) if vmem_cap >= (100 << 20) else (4 << 20)

    # ---- tile selection ----------------------------------------------------------------
    # Spatial tile: lane-dense multiple of 128, or the full extent (always legal).
    thw_cap = max(_LANE, (target_in_bytes // (sub * C_pad * itemsize)) // _LANE * _LANE)
    THW = HW if HW <= thw_cap else thw_cap

    # Batch tile: full extent when N is small, otherwise a sublane multiple grown toward
    # the byte target (amortizes ~0.35 us per-step overhead for small feature maps).
    if N <= sub:
        TN = N
    else:
        per_img = max(1, C_pad * THW * itemsize)
        TN = max(sub, min((target_in_bytes // per_img) // sub * sub, (N // sub) * sub))

    # Give v7x's two TensorCores something to shard: force >= 2 grid steps when possible.
    if pl.cdiv(N, TN) * pl.cdiv(HW, THW) < 2:
        if HW > _LANE:
            THW = max(_LANE, (pl.cdiv(HW, 2) // _LANE) * _LANE)
        elif TN >= 2 * sub:
            TN = max(sub, (TN // 2) // sub * sub)

    grid = (pl.cdiv(N, TN), pl.cdiv(HW, THW))

    # ---- layout (no padding copies: Pallas handles edge blocks) -------------------------
    x_flat = x_nchw.reshape(N, C, HW)             # spatial axis lane-dense (last)
    w1d = weight.reshape(C).astype(jnp.float32)

    # Honest VMEM budget: double-buffered in/out blocks (with sublane padding) plus the
    # kernel's f32 accumulator temporaries, with headroom below physical VMEM.
    in_bytes = 2 * TN * C_pad * THW * itemsize
    out_bytes = 2 * _round_up(TN, sub) * THW * itemsize
    tmp_bytes = 2 * _round_up(TN, 8) * THW * 4
    vmem_limit = int(min(max(in_bytes + out_bytes + tmp_bytes + (2 << 20), 8 << 20),
                         max(vmem_cap - (16 << 20), 32 << 20)))

    cost = pl.CostEstimate(
        flops=2 * N * C * HW,
        transcendentals=0,
        bytes_accessed=itemsize * (N * C * HW + N * HW) + 4 * C,
    )

    out = pl.pallas_call(
        _attention_map_kernel,
        out_shape=jax.ShapeDtypeStruct((N, HW), dtype),
        grid_spec=pltpu.PrefetchScalarGridSpec(
            num_scalar_prefetch=0,
            grid=grid,
            in_specs=[
                pl.BlockSpec(memory_space=pltpu.MemorySpace.SMEM),     # (C,) weight
                pl.BlockSpec((TN, C, THW), lambda n, s: (n, 0, s)),    # input block
            ],
            out_specs=pl.BlockSpec((TN, THW), lambda n, s: (n, s)),
        ),
        compiler_params=pltpu.CompilerParams(
            dimension_semantics=("parallel", "parallel"),
            vmem_limit_bytes=vmem_limit,
        ),
        cost_estimate=cost,
    )(w1d, x_flat)

    return out.reshape(N, 1, H, W)


if __name__ == "__main__":
    key = jax.random.PRNGKey(0)
    k_x, k_w = jax.random.split(key)

    N, C, H, W = 2, 4, 16, 16
    x = jax.random.normal(k_x, (N, C, H, W), dtype=jnp.float32)

    # Deterministic conv weight (shape matches nn.Conv2d(C, 1, kernel_size=1, bias=False))
    bound = 1.0 / (C ** 0.5)
    weight = jax.random.uniform(k_w, (1, C, 1, 1), dtype=jnp.float32,
                                minval=-bound, maxval=bound)

    y = attention_map_forward(x, weight)
    jax.block_until_ready(y)

    # Reference check in plain JAX (1x1 conv + ReLU)
    ref = jnp.maximum(
        jnp.einsum("nchw,oc->nohw", x, weight.reshape(1, C)), 0.0
    )
    assert y.shape == (N, 1, H, W)
    assert jnp.allclose(y, ref, atol=1e-5, rtol=1e-5)

    print("KERNEL_OK")
</pallas_src>

<mosaic_0001>
module attributes {stable_mosaic.version = 11 : i64} {
  func.func @_attention_map_kernel(%arg0: i32, %arg1: i32, %arg2: memref<4xf32, #tpu.memory_space<smem>>, %arg3: memref<2x4x128xf32, #tpu.memory_space<vmem>>, %arg4: memref<2x128xf32, #tpu.memory_space<vmem>>) attributes {dimension_semantics = [#tpu.dimension_semantics<parallel>, #tpu.dimension_semantics<parallel>], iteration_bounds = array<i64: 1, 2>, scalar_prefetch = 0 : i64, scratch_operands = 0 : i64, tpu.core_type = #tpu.core_type<tc>, window_params = [{transform_indices = @transform_0, window_bounds = array<i64: 4>}, {transform_indices = @transform_1, window_bounds = array<i64: 2, 4, 128>}, {transform_indices = @transform_2, window_bounds = array<i64: 2, 128>}]} {
    %c0 = arith.constant 0 : index
    %c0_0 = arith.constant 0 : index
    %c0_1 = arith.constant 0 : index
    %0 = vector.load %arg3[%c0, %c0_0, %c0_1] : memref<2x4x128xf32, #tpu.memory_space<vmem>>, vector<2x1x128xf32>
    %1 = vector.shape_cast %0 : vector<2x1x128xf32> to vector<2x128xf32>
    %c0_2 = arith.constant 0 : index
    %2 = memref.load %arg2[%c0_2] : memref<4xf32, #tpu.memory_space<smem>>
    %3 = vector.broadcast %2 : f32 to vector<2x128xf32>
    %4 = arith.mulf %1, %3 : vector<2x128xf32>
    %c0_3 = arith.constant 0 : index
    %c1 = arith.constant 1 : index
    %c0_4 = arith.constant 0 : index
    %5 = vector.load %arg3[%c0_3, %c1, %c0_4] : memref<2x4x128xf32, #tpu.memory_space<vmem>>, vector<2x1x128xf32>
    %6 = vector.shape_cast %5 : vector<2x1x128xf32> to vector<2x128xf32>
    %c1_5 = arith.constant 1 : index
    %7 = memref.load %arg2[%c1_5] : memref<4xf32, #tpu.memory_space<smem>>
    %8 = vector.broadcast %7 : f32 to vector<2x128xf32>
    %9 = arith.mulf %6, %8 : vector<2x128xf32>
    %10 = arith.addf %4, %9 : vector<2x128xf32>
    %c0_6 = arith.constant 0 : index
    %c2 = arith.constant 2 : index
    %c0_7 = arith.constant 0 : index
    %11 = vector.load %arg3[%c0_6, %c2, %c0_7] : memref<2x4x128xf32, #tpu.memory_space<vmem>>, vector<2x1x128xf32>
    %12 = vector.shape_cast %11 : vector<2x1x128xf32> to vector<2x128xf32>
    %c2_8 = arith.constant 2 : index
    %13 = memref.load %arg2[%c2_8] : memref<4xf32, #tpu.memory_space<smem>>
    %14 = vector.broadcast %13 : f32 to vector<2x128xf32>
    %15 = arith.mulf %12, %14 : vector<2x128xf32>
    %16 = arith.addf %10, %15 : vector<2x128xf32>
    %c0_9 = arith.constant 0 : index
    %c3 = arith.constant 3 : index
    %c0_10 = arith.constant 0 : index
    %17 = vector.load %arg3[%c0_9, %c3, %c0_10] : memref<2x4x128xf32, #tpu.memory_space<vmem>>, vector<2x1x128xf32>
    %18 = vector.shape_cast %17 : vector<2x1x128xf32> to vector<2x128xf32>
    %c3_11 = arith.constant 3 : index
    %19 = memref.load %arg2[%c3_11] : memref<4xf32, #tpu.memory_space<smem>>
    %20 = vector.broadcast %19 : f32 to vector<2x128xf32>
    %21 = arith.mulf %18, %20 : vector<2x128xf32>
    %22 = arith.addf %16, %21 : vector<2x128xf32>
    %cst = arith.constant 0.000000e+00 : f32
    %23 = vector.broadcast %cst : f32 to vector<2x128xf32>
    %24 = arith.maximumf %22, %23 : vector<2x128xf32>
    %c0_12 = arith.constant 0 : index
    %c0_13 = arith.constant 0 : index
    %25 = vector.load %arg4[%c0_12, %c0_13] : memref<2x128xf32, #tpu.memory_space<vmem>>, vector<2x128xf32>
    tpu.vector_store %arg4[%c0_12, %c0_13], %24 {strides = array<i32>} : memref<2x128xf32, #tpu.memory_space<vmem>>, vector<2x128xf32>,
    return
  }
  func.func @transform_0(%arg0: i32, %arg1: i32) -> i32 {
    %c0_i32 = arith.constant 0 : i32
    %c0_i32_0 = arith.constant 0 : i32
    return %c0_i32 : i32
  }
  func.func @transform_1(%arg0: i32, %arg1: i32) -> (i32, i32, i32) {
    %c0_i32 = arith.constant 0 : i32
    %c0_i32_0 = arith.constant 0 : i32
    return %arg0, %c0_i32, %arg1 : i32, i32, i32
  }
  func.func @transform_2(%arg0: i32, %arg1: i32) -> (i32, i32) {
    %c0_i32 = arith.constant 0 : i32
    return %arg0, %arg1 : i32, i32
  }
}

</mosaic_0001>

<bundles_post_ra>
// kernel: tpu_custom_call.1
= control target key start
LH: loop header
LB: loop body
LE: loop exit
PB: predicated region body
PF: predicated region fallthrough
CT: control target
= control target key end

     0   :  { %7 = vsyncpa [#allocation5], 0  ;;  %s788_s0 = inlined_call_operand.hbm [shape: f32[4], index: 0, kind: input, shape index: {}]   ;;  %s789_s1 = inlined_call_operand.hbm [shape: f32[2,4,256], index: 1, kind: input, shape index: {}]   ;;  %s790_s2 = inlined_call_operand.hbm [shape: f32[2,256], index: 2, kind: output, shape index: {}]  }
   0x1   :  { %8 = vsyncpa [#allocation3], 0 }
   0x2   :  { %10 = vsyncpa [#allocation3 + $0x1], 0 }
   0x3   :  { %11 = vsyncpa [#allocation4], 0 }
   0x4   :  { %13 = vsyncpa [#allocation4 + $0x1], 0  ;;  %s588_s9 = smov 0   ;;  %s590_s10 = smov 0  }
   0x5   :  { %s592_s11 = smov 0   ;;  %s594_s12 = smov 0  }
   0x6   :  { %s596_s13 = smov 0   ;;  %s598_s14 = smov 0  }
   0x7 LB: > { %s342_s15 = sadd.s32 4294967295, %s565_s14   ;;  %s343_s16 = sadd.s32 4294967294, %s565_s14   ;;  %s565_s14 = sphi %s598_s14, %s19_s14   ;;  %s561_s13 = sphi %s596_s13, %s810_s13   ;;  %s557_s12 = sphi %s594_s12, %s809_s12   ;;  %s553_s11 = sphi %s592_s11, %s808_s11   ;;  %s549_s10 = sphi %s590_s10, %s807_s10   ;;  %s545_s9 = sphi %s588_s9, %s806_s9  }
   0x8   : > { %s61_s17 = sadd.s32 1, %s553_s11  ;;  %p68_p0 = scmp.ne.s32.totalorder %s553_s11, %s549_s10 }
   0x9   : > { %p69_p1 = scmp.eq.s32.totalorder %s565_s14, 0  ;;  %p74_p2 = scmp.ne.s32.totalorder %s549_s10, %s545_s9 }
   0xa   : > { %p626_p3 = scmp.eq.s32.totalorder %s342_s15, 0  ;;  %p100_p4 = scmp.eq.s32.totalorder %s342_s15, 1 }
   0xb   : > { %p70_p5 = por %p69_p1, %p68_p0  ;;  %p106_p6 = scmp.eq.s32.totalorder %s343_s16, 1 }
   0xc   : > { %s795_s18 = scalar_select %p626_p3, 1, 0 }
   0xd   : > { %p632_p7 = por %p626_p3, %p74_p2  ;;  %p636_p8 = por %p100_p4, %p68_p0 }
   0xe   : > { %p640_p9 = por %p106_p6, %p74_p2  ;;  %p344_p10 = scmp.ge.s32.totalorder %s565_s14, 1 }
   0xf   : > { %s796_s19 = scalar_select %p632_p7, 1, 0 }
  0x10   : > { %s797_s20 = scalar_select %p636_p8, 1, 0 }
  0x11   : > { %s798_s21 = scalar_select %p640_p9, 1, 0 }
  0x12   : > { %p113_p11 = scmp.lt.s32.totalorder %s565_s14, 3  ;;  %p381_p1 = scmp.lt.s32.totalorder %s565_s14, 2 }
  0x13   : > { %s135_s23 = sand.u32 1, %s553_s11   ;;  %s28_s25 = sadd.s32 1, %s561_s13 }
  0x14   : > { %p647_p13 = pnand %p344_p10, %p113_p11  ;;  %p655_p0 = pnand %p381_p1, %p70_p5 }
  0x15   : > { %s347_s26 = sshll.u32 %s135_s23, 3  ;;  %p29_p4 = scmp.ge.s32.totalorder %s28_s25, 2 }
  0x16   : > { %p368_p7 = pneg %p647_p13  ;;  %s436_s29 = scalar_lea.hbm %s788_s0, 16 }
  0x17   : > { %p437_p6 = scmp.ne.s32.totalorder %s788_s0, %s436_s29  ;;  %p443_p5 = scmp.lt.u32.totalorder %s436_s29, %s788_s0 }
  0x18   : > { %p369_p2 = pnand %p368_p7, %p626_p3 }
  0x1a   : > { %p438_p10 = pneg %p369_p2 }
  0x1c   : > { %p439_p11 = pnand %p438_p10, %p437_p6 }
  0x1e   : > { %p440_p12 = pneg %p439_p11 }
  0x20   : > { %p445_p1 = pnand %p443_p5, %p440_p12 }
  0x22   : > { %448 = shalt.err (!%p445_p1)
}
  0x23   : > { %s567_s6 = smov [#allocation2]   ;;  %s812_s25 = smov (%p29_p4, %s28_s25), 0 }
  0x24   : > { %371 = dma.hbm_to_smem (!%p369_p2), %s788_s0, 16, %s567_s6, [#allocation5]  }
  0x25   : > { %s348_s15 = sshll.u32 %s561_s13, 6  ;;  %s57_s16 = ssub.s32 %s561_s13, %s812_s25 }
  0x26   : > { %s682_s29 = scalar_lea.hbm %s789_s1, %s348_s15  ;;  %p59_p7 = scmp.eq.s32.totalorder %s57_s16, 0 }
  0x27   : > { %s139_s30 = scalar_lea.vmem [#allocation6], %s347_s26  ;;  %s691_s5 = scalar_lea.sflag [#allocation3], %s135_s23 }
  0x28   : > { %s148_s3 = sshll.u32 %s139_s30, 4  ;;  %s449_s6 = scalar_lea.hbm %s682_s29, 128  ;;  %s684_s3 = int_to_ptr.vmem [resolvable:$true] %s148_s3 }
  0x29   : > { %s689_s4 = scalar_select %p59_p7, %s553_s11, %s61_s17  }
  0x2a   : > { %p450_p12 = scmp.ne.s32.totalorder %s682_s29, %s449_s6  ;;  %p451_p2 = pneg %p655_p0 }
  0x2b   : > { %s454_s26 = scalar_lea.hbm %s789_s1, 256  ;;  %p455_p10 = scmp.lt.u32.totalorder %s682_s29, %s789_s1 }
  0x2c   : > { %p452_p4 = pnand %p451_p2, %p450_p12  ;;  %p456_p11 = scmp.lt.u32.totalorder %s454_s26, %s449_s6 }
  0x2d   : > { %p458_p1 = scmp.lt.u32.totalorder %s449_s6, %s682_s29 }
  0x2e   : > { %p453_p6 = pneg %p452_p4  ;;  %p457_p5 = por %p456_p11, %p455_p10 }
  0x30   : > { %p459_p7 = por %p458_p1, %p457_p5 }
  0x32   : > { %p460_p9 = pnand %p459_p7, %p453_p6 }
  0x34   : > { %463 = shalt.err (!%p460_p9)
}
  0x35   : > { %s464_s17 = scalar_lea.vmem %s684_s3, 128  ;;  %s568_s23 = smov [#allocation6]  }
  0x36   : > { %p465_p12 = scmp.ne.s32.totalorder %s684_s3, %s464_s17  ;;  %s469_s27 = sshll.u32 %s568_s23, 4  ;;  %s470_s27 = int_to_ptr.vmem [resolvable:$false] %s469_s27 }
  0x37   : > { %s471_s28 = scalar_lea.vmem %s470_s27, 256  ;;  %p472_p3 = scmp.lt.s32.totalorder %s684_s3, %s470_s27 }
  0x38   : > { %p467_p4 = pnand %p465_p12, %p451_p2  ;;  %p473_p10 = scmp.lt.s32.totalorder %s471_s28, %s464_s17 }
  0x3a   : > { %p468_p8 = pneg %p467_p4  ;;  %p474_p11 = por %p473_p10, %p472_p3 }
  0x3c   : > { %p475_p5 = pnand %p474_p11, %p468_p8 }
  0x3e   : > { %478 = shalt.err (!%p475_p5)
}
  0x3f   : > { %s569_s30 = smov 128   ;;  %s570_s6 = smov 64  }
  0x40   : > { %s571_s7 = smov 4   ;;  %160 = sbr.rel (%p647_p13) target bundleno = 112 (0x70), region = 28 }
  0x41   : > { %375 = dma.hbm_to_vmem [thread:$0]  (!%p655_p0), %s682_s29, 128, %s684_s3, %s691_s5, %s569_s30, %s570_s6, %s571_s7  }
  0x42   : > { %p801_p9 = scmp.ne.s32.totalorder (!%p647_p13), %s795_s18, 0 }
  0x47   : > { %532 = dma.done.wait (%p801_p9), [#allocation5], 16  }
  0x48   : > { %534 = vsyncadd (%p801_p9), [#allocation5], 4294967280  ;;  %s726_s8 = sand.u32 1, %s549_s10   ;;  %p802_p3 = scmp.ne.s32.totalorder %s796_s19, 0 }
  0x49   : > { %s351_s26 = sshll.u32 %s726_s8, 3  ;;  %s167_s15 = scalar_lea.sflag [#allocation3], %s726_s8 }
  0x4a   : > { %s170_s16 = scalar_lea.vmem [#allocation6], %s351_s26 }
  0x4b   : > { %536 = dma.done.wait (%p802_p3), %s167_s15, 128  }
  0x4c   : > { %538 = vsyncadd (%p802_p3), %s167_s15, 4294967168 }
  0x4d   : > { %175 = sfence }
  0x4e   : > { %s195_s22 = sld [smem:[#allocation2]]  ;;  %s353_s24 = sld [smem:[#allocation2 + $0x1]]  ;;  %v193_v0 = vld [vmem:[%s170_s16] sm:$0x1]  ;;  %v194_v1 = vld [vmem:[%s170_s16 + $0x4] sm:$0x1] }
  0x4f   : > { %s354_s29 = sld [smem:[#allocation2 + $0x2]]  ;;  %s355_s18 = sld [smem:[#allocation2 + $0x3]]  ;;  %v199_v2 = vld [vmem:[%s170_s16 + $0x1] sm:$0x1]  ;;  %v200_v3 = vld [vmem:[%s170_s16 + $0x5] sm:$0x1] }
  0x50   : > { %v207_v5 = vld [vmem:[%s170_s16 + $0x2] sm:$0x1]  ;;  %v208_v6 = vld [vmem:[%s170_s16 + $0x6] sm:$0x1]  ;;  %v215_v10 = vld [vmem:[%s170_s16 + $0x3] sm:$0x1] }
  0x51   : > { %v216_v11 = vld [vmem:[%s170_s16 + $0x7] sm:$0x1]  ;;  %s352_s19 = sshll.u32 %s726_s8, 1  ;;  %s357_s17 = sshll.u32 %s557_s12, 5  ;;  %vm228_vm0 = vcmask 1041409  }
  0x52   : > { %s191_s3 = scalar_lea.vmem [#allocation7], %s352_s19  ;;  %s741_s28 = scalar_lea.hbm %s790_s2, %s357_s17 }
  0x53   : > { %s248_s5 = sshll.u32 %s191_s3, 4  ;;  %s233_s30 = scalar_lea.sflag [#allocation4], %s726_s8  ;;  %s736_s5 = int_to_ptr.vmem [resolvable:$true] %s248_s5 }
  0x54   : > { %v196_v4 = vstv %s195_s22  ;;  %v202_v9 = vstv %s353_s24  ;;  %s479_s6 = scalar_lea.vmem %s736_s5, 32  ;;  %p803_p13 = scmp.ne.s32.totalorder %s797_s20, 0 }
  0x55   : > { %v197_v7 = vmul.f32 %v196_v4, %v193_v0  ;;  %v198_v8 = vmul.f32 %v196_v4, %v194_v1  ;;  %v203_v12 = vmul.f32 %v202_v9, %v199_v2  ;;  %v204_v13 = vmul.f32 %v202_v9, %v200_v3  ;;  %p480_p8 = scmp.ne.s32.totalorder %s736_s5, %s479_s6  ;;  %s572_s12 = smov [#allocation7]  }
  0x56   : > { %v210_v14 = vstv %s354_s29  ;;  %v218_v17 = vstv %s355_s18  ;;  %s483_s7 = sshll.u32 %s572_s12, 4  ;;  %s484_s7 = int_to_ptr.vmem [resolvable:$false] %s483_s7 }
  0x57   : > { %v211_v15 = vmul.f32 %v210_v14, %v207_v5  ;;  %v212_v16 = vmul.f32 %v210_v14, %v208_v6  ;;  %v205_v18 = vadd.f32 %v203_v12, %v197_v7  ;;  %v206_v19 = vadd.f32 %v204_v13, %v198_v8  ;;  %p481_p0 = pnand %p480_p8, %p803_p13  ;;  %s485_s26 = scalar_lea.vmem %s484_s7, 64 }
  0x58   : > { %v219_v20 = vmul.f32 %v218_v17, %v215_v10  ;;  %v220_v21 = vmul.f32 %v218_v17, %v216_v11  ;;  %p486_p6 = scmp.lt.s32.totalorder %s736_s5, %s484_s7  ;;  %p487_p1 = scmp.lt.s32.totalorder %s485_s26, %s479_s6 }
  0x59   : > { %v213_v22 = vadd.f32 %v211_v15, %v205_v18  ;;  %v214_v23 = vadd.f32 %v212_v16, %v206_v19  ;;  %p482_p2 = pneg %p481_p0 }
  0x5a   : > { %p488_p7 = por %p487_p1, %p486_p6 }
  0x5b   : > { %v221_v24 = vadd.f32 %v219_v20, %v213_v22  ;;  %v222_v25 = vadd.f32 %v220_v21, %v214_v23 }
  0x5c   : > { %p489_p12 = pnand %p488_p7, %p482_p2 }
  0x5d   : > { %v223_v26 = vmax.f32 %v221_v24, 0.0  ;;  %v224_v27 = vmax.f32 %v222_v25, 0.0 }
  0x5f   : > { %v227_v28 = vrot.slane %v224_v27, 7 }
  0x61   : > { %v229_v29 = vsel %vm228_vm0, %v227_v28, %v223_v26 }
  0x62   : > { %231 = vst [vmem:[%s191_s3] sm:$0x3] %v229_v29 }
  0x63   : > { %492 = shalt.err (!%p489_p12)
}
  0x64   : > { %s493_s8 = scalar_lea.hbm %s741_s28, 32  ;;  %s497_s22 = scalar_lea.hbm %s790_s2, 64 }
  0x65   : > { %p494_p4 = scmp.ne.s32.totalorder %s741_s28, %s493_s8  ;;  %p498_p5 = scmp.lt.u32.totalorder %s741_s28, %s790_s2 }
  0x66   : > { %p499_p9 = scmp.lt.u32.totalorder %s497_s22, %s493_s8  ;;  %p501_p8 = scmp.lt.u32.totalorder %s493_s8, %s741_s28 }
  0x67   : > { %p495_p10 = pnand %p494_p4, %p803_p13 }
  0x68   : > { %p500_p3 = por %p499_p9, %p498_p5 }
  0x69   : > { %p496_p11 = pneg %p495_p10 }
  0x6a   : > { %p502_p0 = por %p501_p8, %p500_p3 }
  0x6c   : > { %p503_p2 = pnand %p502_p0, %p496_p11 }
  0x6e   : > { %506 = shalt.err (!%p503_p2)
}
  0x6f   : > { %366 = dma.vmem_to_hbm [thread:$0]  (%p803_p13), %s736_s5, 32, %s741_s28, %s233_s30  }
  0x70 PF: > { %s260_s18 = sand.u32 1, %s545_s9   ;;  %p804_p6 = scmp.ne.s32.totalorder %s798_s21, 0 }
  0x71   : > { %p805_p1 = scmp.ge.s32.totalorder %s565_s14, 2  ;;  %s261_s19 = scalar_lea.sflag [#allocation4], %s260_s18 }
  0x73   : > { %p377_p7 = pnand %p805_p1, %p804_p6 }
  0x75   : > { %540 = dma.done.wait (!%p377_p7), %s261_s19, 32  }
  0x76   : > { %542 = vsyncadd (!%p377_p7), %s261_s19, 4294967264  ;;  %s19_s14 = sadd.s32 1, %s565_s14   ;;  %s806_s9 = smov %s549_s10 }
  0x77   : > { %p16_p12 = scmp.ge.s32.totalorder %s19_s14, 4   ;;  %s807_s10 = smov %s553_s11 }
  0x78   : > { %s808_s11 = smov %s689_s4  ;;  %s809_s12 = smov %s561_s13 }
  0x79   : > { %s810_s13 = smov %s812_s25  ;;  %18 = sbr.rel (!%p16_p12) target bundleno = 7 (0x7), region = 78 }
  0x80   :  { %266 = vsyncpa [#allocation3], 1 }
  0x81   :  { %268 = vsyncpa [#allocation3 + $0x1], 1 }
  0x82   :  { %269 = vsyncpa [#allocation4], 1 }
  0x83   :  { %271 = vsyncpa [#allocation4 + $0x1], 1 }
  0x84   :  { %272 = vsyncpa [#allocation5], 1 }
  0x85   :  { %274 = vsyncpa [#allocation5 + $0x1], 1 }

</bundles_post_ra>
